<compile_context>
chip_gen: v7x
topology: tpu7x:2x2x1
jax: 0.10.0
libtpu: 0.0.40
codegen_flags: <defaults>
</compile_context>

<pallas_src>
import jax
import jax.numpy as jnp
from jax.experimental import pallas as pl
from jax.experimental.pallas import tpu as pltpu

HIDDEN = 512
MAX_TILE_B = 256   # up to 256 batch rows per grid step (MXU fill on v6e/v7x)
NEG_INF = -1e30    # fill value for padded fc3 bias columns


def _round_up(x, m):
    return m * ((x + m - 1) // m)


def ann_kernel(x_ref, w1_ref, b1_ref, w2_ref, b2_ref, w3_ref, b3_ref, o_ref):
    # fc1 + ReLU: cast x to bf16 in-kernel (no extra HBM pass), f32 MXU accum.
    x = x_ref[...].astype(jnp.bfloat16)
    h1 = jnp.dot(x, w1_ref[...], preferred_element_type=jnp.float32)
    h1 = jnp.maximum(h1 + b1_ref[...], 0.0)
    # dropout(p=0.3) -> identity (eval/inference mode)
    # TODO(synk): training-mode dropout (random mask + 1/(1-p) scaling) not implemented
    # fc2 + ReLU
    h2 = jnp.dot(h1.astype(jnp.bfloat16), w2_ref[...],
                 preferred_element_type=jnp.float32)
    h2 = jnp.maximum(h2 + b2_ref[...], 0.0)
    # dropout -> identity again (eval mode)
    # fc3: padded weight columns are zero and padded bias columns are -1e30,
    # so padded logits are ~-1e30 and contribute 0 after exp() -- no mask ops.
    logits = jnp.dot(h2.astype(jnp.bfloat16), w3_ref[...],
                     preferred_element_type=jnp.float32) + b3_ref[...]
    # numerically stable softmax along dim=1 (EUP reciprocal for the denom)
    m = jnp.max(logits, axis=1, keepdims=True)
    e = jnp.exp(logits - m)
    inv = pl.reciprocal(jnp.sum(e, axis=1, keepdims=True), approx=True)
    o_ref[...] = (e * inv).astype(o_ref.dtype)


def _choose_batch_tiling(batch):
    """Pick (tile_b, num_tiles) with tile_b a multiple of 8, <= ~256 rows."""
    b8 = _round_up(batch, 8)
    num_tiles = max(1, pl.cdiv(b8, MAX_TILE_B))
    # Give v7x's second TensorCore work when there is enough batch for it.
    if num_tiles == 1 and b8 > 128:
        num_tiles = 2
    tile_b = _round_up(pl.cdiv(b8, num_tiles), 8)
    return tile_b, num_tiles


def ann_forward(x, params):
    """x: (B, input_dim) f32. params: transposed weights (in, out) + biases (1, out)."""
    w1, b1 = params["w1"], params["b1"]
    w2, b2 = params["w2"], params["b2"]
    w3, b3 = params["w3"], params["b3"]
    batch, input_dim = x.shape
    out_dim = w3.shape[1]
    out_pad = _round_up(out_dim, 128)   # lane-dense padded logits width

    tile_b, num_tiles = _choose_batch_tiling(batch)
    padded_b = tile_b * num_tiles
    if padded_b != batch:
        x = jnp.pad(x, ((0, padded_b - batch), (0, 0)))

    # Pad fc3 to out_pad lanes: zero weight columns, -1e30 bias columns.
    w3p = jnp.pad(w3, ((0, 0), (0, out_pad - out_dim)))
    b3p = jnp.pad(b3, ((0, 0), (0, out_pad - out_dim)), constant_values=NEG_INF)

    # bf16 weights into the MXU (in real serving these casts are done once);
    # x stays f32 in HBM and is cast inside the kernel. Biases stay f32.
    w1_bf = w1.astype(jnp.bfloat16)
    w2_bf = w2.astype(jnp.bfloat16)
    w3_bf = w3p.astype(jnp.bfloat16)

    flops = 2 * padded_b * (input_dim * HIDDEN + HIDDEN * HIDDEN + HIDDEN * out_pad)
    bytes_accessed = (x.size * 4 + w1_bf.size * 2 + w2_bf.size * 2
                      + w3_bf.size * 2 + b1.size * 4 + b2.size * 4 + b3p.size * 4
                      + padded_b * out_pad * 4)

    out = pl.pallas_call(
        ann_kernel,
        out_shape=jax.ShapeDtypeStruct((padded_b, out_pad), jnp.float32),
        grid_spec=pltpu.PrefetchScalarGridSpec(
            num_scalar_prefetch=0,
            grid=(num_tiles,),
            in_specs=[
                pl.BlockSpec((tile_b, input_dim), lambda i: (i, 0)),   # x (pipelined, f32)
                pl.BlockSpec((input_dim, HIDDEN), lambda i: (0, 0)),   # w1 (VMEM-resident)
                pl.BlockSpec((1, HIDDEN), lambda i: (0, 0)),           # b1
                pl.BlockSpec((HIDDEN, HIDDEN), lambda i: (0, 0)),      # w2
                pl.BlockSpec((1, HIDDEN), lambda i: (0, 0)),           # b2
                pl.BlockSpec((HIDDEN, out_pad), lambda i: (0, 0)),     # w3 (padded)
                pl.BlockSpec((1, out_pad), lambda i: (0, 0)),          # b3 (padded, -1e30)
            ],
            out_specs=pl.BlockSpec((tile_b, out_pad), lambda i: (i, 0)),
        ),
        compiler_params=pltpu.CompilerParams(
            dimension_semantics=("parallel",)),
        cost_estimate=pl.CostEstimate(
            flops=flops,
            transcendentals=padded_b * out_pad,
            bytes_accessed=bytes_accessed),
    )(x, w1_bf, b1, w2_bf, b2, w3_bf, b3p)

    # Strip batch padding and the zero-padded logit columns.
    return out[:batch, :out_dim]


def init_params(key, input_dim, output_dim):
    """Deterministic init mimicking nn.Linear default (uniform +-1/sqrt(fan_in)).
    Weights stored already transposed: (in_features, out_features)."""
    ks = jax.random.split(key, 6)

    def lin(kw, kb, fan_in, fan_out):
        bound = 1.0 / jnp.sqrt(fan_in)
        w = jax.random.uniform(kw, (fan_in, fan_out), jnp.float32, -bound, bound)
        b = jax.random.uniform(kb, (1, fan_out), jnp.float32, -bound, bound)
        return w, b

    w1, b1 = lin(ks[0], ks[1], input_dim, HIDDEN)
    w2, b2 = lin(ks[2], ks[3], HIDDEN, HIDDEN)
    w3, b3 = lin(ks[4], ks[5], HIDDEN, output_dim)
    return {"w1": w1, "b1": b1, "w2": w2, "b2": b2, "w3": w3, "b3": b3}


if __name__ == "__main__":
    key = jax.random.PRNGKey(0)
    k_x, k_p = jax.random.split(key)

    batch, input_dim, output_dim = 8, 64, 16
    x = jax.random.normal(k_x, (batch, input_dim), dtype=jnp.float32)
    params = init_params(k_p, input_dim, output_dim)

    out = ann_forward(x, params)
    jax.block_until_ready(out)

    # reference check (pure JAX, f32) + softmax row-sum sanity
    h1 = jnp.maximum(x @ params["w1"] + params["b1"], 0.0)
    h2 = jnp.maximum(h1 @ params["w2"] + params["b2"], 0.0)
    ref = jax.nn.softmax(h2 @ params["w3"] + params["b3"], axis=1)

    row_sums = jnp.sum(out, axis=1)
    assert out.shape == (batch, output_dim)
    assert bool(jnp.all(jnp.abs(row_sums - 1.0) < 2e-3))
    assert bool(jnp.max(jnp.abs(out - ref)) < 2e-2)   # bf16 matmul tolerance

    print("KERNEL_OK")
</pallas_src>

<mosaic_0001>
module attributes {stable_mosaic.version = 11 : i64} {
  func.func @ann_kernel(%arg0: i32, %arg1: memref<8x64xf32, #tpu.memory_space<vmem>>, %arg2: memref<64x512xbf16, #tpu.memory_space<vmem>>, %arg3: memref<1x512xf32, #tpu.memory_space<vmem>>, %arg4: memref<512x512xbf16, #tpu.memory_space<vmem>>, %arg5: memref<1x512xf32, #tpu.memory_space<vmem>>, %arg6: memref<512x128xbf16, #tpu.memory_space<vmem>>, %arg7: memref<1x128xf32, #tpu.memory_space<vmem>>, %arg8: memref<8x128xf32, #tpu.memory_space<vmem>>) attributes {dimension_semantics = [#tpu.dimension_semantics<parallel>], iteration_bounds = array<i64: 1>, scalar_prefetch = 0 : i64, scratch_operands = 0 : i64, tpu.core_type = #tpu.core_type<tc>, window_params = [{transform_indices = @transform_0, window_bounds = array<i64: 8, 64>}, {pipeline_mode = #tpu.pipeline_mode<synchronous>, transform_indices = @transform_1, window_bounds = array<i64: 64, 512>}, {pipeline_mode = #tpu.pipeline_mode<synchronous>, transform_indices = @transform_2, window_bounds = array<i64: 1, 512>}, {pipeline_mode = #tpu.pipeline_mode<synchronous>, transform_indices = @transform_3, window_bounds = array<i64: 512, 512>}, {pipeline_mode = #tpu.pipeline_mode<synchronous>, transform_indices = @transform_4, window_bounds = array<i64: 1, 512>}, {pipeline_mode = #tpu.pipeline_mode<synchronous>, transform_indices = @transform_5, window_bounds = array<i64: 512, 128>}, {pipeline_mode = #tpu.pipeline_mode<synchronous>, transform_indices = @transform_6, window_bounds = array<i64: 1, 128>}, {transform_indices = @transform_7, window_bounds = array<i64: 8, 128>}]} {
    %c0 = arith.constant 0 : index
    %c0_0 = arith.constant 0 : index
    %0 = vector.load %arg1[%c0, %c0_0] : memref<8x64xf32, #tpu.memory_space<vmem>>, vector<8x64xf32>
    %1 = arith.truncf %0 : vector<8x64xf32> to vector<8x64xbf16>
    %c0_1 = arith.constant 0 : index
    %c0_2 = arith.constant 0 : index
    %2 = vector.load %arg2[%c0_1, %c0_2] : memref<64x512xbf16, #tpu.memory_space<vmem>>, vector<64x512xbf16>
    %cst = arith.constant dense<0.000000e+00> : vector<8x512xf32>
    %3 = tpu.matmul %1, %2, %cst {dimension_numbers = #tpu.dot_dimension_numbers<[1], [0], [0], [1], [0, 0, 1, 1], [], []>} : vector<8x64xbf16>, vector<64x512xbf16>, vector<8x512xf32> -> vector<8x512xf32>
    %c0_3 = arith.constant 0 : index
    %c0_4 = arith.constant 0 : index
    %4 = vector.load %arg3[%c0_3, %c0_4] : memref<1x512xf32, #tpu.memory_space<vmem>>, vector<1x512xf32>
    %5 = vector.broadcast %4 : vector<1x512xf32> to vector<8x512xf32>
    %6 = arith.addf %3, %5 : vector<8x512xf32>
    %cst_5 = arith.constant 0.000000e+00 : f32
    %7 = vector.broadcast %cst_5 : f32 to vector<8x512xf32>
    %8 = arith.maximumf %6, %7 : vector<8x512xf32>
    %9 = arith.truncf %8 : vector<8x512xf32> to vector<8x512xbf16>
    %c0_6 = arith.constant 0 : index
    %c0_7 = arith.constant 0 : index
    %10 = vector.load %arg4[%c0_6, %c0_7] : memref<512x512xbf16, #tpu.memory_space<vmem>>, vector<512x512xbf16>
    %cst_8 = arith.constant dense<0.000000e+00> : vector<8x512xf32>
    %11 = tpu.matmul %9, %10, %cst_8 {dimension_numbers = #tpu.dot_dimension_numbers<[1], [0], [0], [1], [0, 0, 1, 1], [], []>} : vector<8x512xbf16>, vector<512x512xbf16>, vector<8x512xf32> -> vector<8x512xf32>
    %c0_9 = arith.constant 0 : index
    %c0_10 = arith.constant 0 : index
    %12 = vector.load %arg5[%c0_9, %c0_10] : memref<1x512xf32, #tpu.memory_space<vmem>>, vector<1x512xf32>
    %13 = vector.broadcast %12 : vector<1x512xf32> to vector<8x512xf32>
    %14 = arith.addf %11, %13 : vector<8x512xf32>
    %cst_11 = arith.constant 0.000000e+00 : f32
    %15 = vector.broadcast %cst_11 : f32 to vector<8x512xf32>
    %16 = arith.maximumf %14, %15 : vector<8x512xf32>
    %17 = arith.truncf %16 : vector<8x512xf32> to vector<8x512xbf16>
    %c0_12 = arith.constant 0 : index
    %c0_13 = arith.constant 0 : index
    %18 = vector.load %arg6[%c0_12, %c0_13] : memref<512x128xbf16, #tpu.memory_space<vmem>>, vector<512x128xbf16>
    %cst_14 = arith.constant dense<0.000000e+00> : vector<8x128xf32>
    %19 = tpu.matmul %17, %18, %cst_14 {dimension_numbers = #tpu.dot_dimension_numbers<[1], [0], [0], [1], [0, 0, 1, 1], [], []>} : vector<8x512xbf16>, vector<512x128xbf16>, vector<8x128xf32> -> vector<8x128xf32>
    %c0_15 = arith.constant 0 : index
    %c0_16 = arith.constant 0 : index
    %20 = vector.load %arg7[%c0_15, %c0_16] : memref<1x128xf32, #tpu.memory_space<vmem>>, vector<1x128xf32>
    %21 = vector.broadcast %20 : vector<1x128xf32> to vector<8x128xf32>
    %22 = arith.addf %19, %21 : vector<8x128xf32>
    %cst_17 = arith.constant dense<0xFF800000> : vector<8xf32>
    %23 = vector.multi_reduction <maximumf>, %22, %cst_17 [1] : vector<8x128xf32> to vector<8xf32>
    %24 = vector.shape_cast %23 : vector<8xf32> to vector<8x1xf32>
    %25 = vector.broadcast %24 : vector<8x1xf32> to vector<8x128xf32>
    %26 = arith.subf %22, %25 : vector<8x128xf32>
    %27 = math.exp %26 : vector<8x128xf32>
    %cst_18 = arith.constant dense<0.000000e+00> : vector<8xf32>
    %28 = vector.multi_reduction <add>, %27, %cst_18 [1] : vector<8x128xf32> to vector<8xf32>
    %29 = vector.shape_cast %28 : vector<8xf32> to vector<8x1xf32>
    %30 = tpu.reciprocal %29 {approx = true} : vector<8x1xf32> -> vector<8x1xf32>
    %31 = vector.broadcast %30 : vector<8x1xf32> to vector<8x128xf32>
    %32 = arith.mulf %27, %31 : vector<8x128xf32>
    %c0_19 = arith.constant 0 : index
    %c0_20 = arith.constant 0 : index
    %33 = vector.load %arg8[%c0_19, %c0_20] : memref<8x128xf32, #tpu.memory_space<vmem>>, vector<8x128xf32>
    tpu.vector_store %arg8[%c0_19, %c0_20], %32 {strides = array<i32>} : memref<8x128xf32, #tpu.memory_space<vmem>>, vector<8x128xf32>,
    return
  }
  func.func @transform_0(%arg0: i32) -> (i32, i32) {
    %c0_i32 = arith.constant 0 : i32
    %c0_i32_0 = arith.constant 0 : i32
    return %arg0, %c0_i32 : i32, i32
  }
  func.func @transform_1(%arg0: i32) -> (i32, i32) {
    %c0_i32 = arith.constant 0 : i32
    %c0_i32_0 = arith.constant 0 : i32
    %c0_i32_1 = arith.constant 0 : i32
    return %c0_i32, %c0_i32_0 : i32, i32
  }
  func.func @transform_2(%arg0: i32) -> (i32, i32) {
    %c0_i32 = arith.constant 0 : i32
    %c0_i32_0 = arith.constant 0 : i32
    %c0_i32_1 = arith.constant 0 : i32
    return %c0_i32, %c0_i32_0 : i32, i32
  }
  func.func @transform_3(%arg0: i32) -> (i32, i32) {
    %c0_i32 = arith.constant 0 : i32
    %c0_i32_0 = arith.constant 0 : i32
    %c0_i32_1 = arith.constant 0 : i32
    return %c0_i32, %c0_i32_0 : i32, i32
  }
  func.func @transform_4(%arg0: i32) -> (i32, i32) {
    %c0_i32 = arith.constant 0 : i32
    %c0_i32_0 = arith.constant 0 : i32
    %c0_i32_1 = arith.constant 0 : i32
    return %c0_i32, %c0_i32_0 : i32, i32
  }
  func.func @transform_5(%arg0: i32) -> (i32, i32) {
    %c0_i32 = arith.constant 0 : i32
    %c0_i32_0 = arith.constant 0 : i32
    %c0_i32_1 = arith.constant 0 : i32
    return %c0_i32, %c0_i32_0 : i32, i32
  }
  func.func @transform_6(%arg0: i32) -> (i32, i32) {
    %c0_i32 = arith.constant 0 : i32
    %c0_i32_0 = arith.constant 0 : i32
    %c0_i32_1 = arith.constant 0 : i32
    return %c0_i32, %c0_i32_0 : i32, i32
  }
  func.func @transform_7(%arg0: i32) -> (i32, i32) {
    %c0_i32 = arith.constant 0 : i32
    %c0_i32_0 = arith.constant 0 : i32
    return %arg0, %c0_i32 : i32, i32
  }
}

</mosaic_0001>

<bundles_post_ra>
// kernel: tpu_custom_call.1
= control target key start
LH: loop header
LB: loop body
LE: loop exit
PB: predicated region body
PF: predicated region fallthrough
CT: control target
= control target key end

     0   :  { %12 = vsyncpa [#allocation3], 0  ;;  %s2400_s0 = inlined_call_operand.hbm [shape: f32[8,64], index: 0, kind: input, shape index: {}]   ;;  %s2401_s1 = inlined_call_operand.hbm [shape: bf16[64,512], index: 1, kind: input, shape index: {}]   ;;  %s2402_s2 = inlined_call_operand.vmem [shape: f32[1,512], index: 2, kind: input, shape index: {}]   ;;  %s2403_s3 = inlined_call_operand.hbm [shape: bf16[512,512], index: 3, kind: input, shape index: {}]   ;;  %s2404_s4 = inlined_call_operand.vmem [shape: f32[1,512], index: 4, kind: input, shape index: {}]   ;;  %s2405_s5 = inlined_call_operand.hbm [shape: bf16[512,128], index: 5, kind: input, shape index: {}]   ;;  %s2406_s6 = inlined_call_operand.vmem [shape: f32[1,128], index: 6, kind: input, shape index: {}]   ;;  %s2407_s7 = inlined_call_operand.hbm [shape: f32[8,128], index: 7, kind: output, shape index: {}]  }
   0x1   :  { %13 = vsyncpa [#allocation6], 0 }
   0x2   :  { %14 = vsyncpa [#allocation9], 0 }
   0x3   :  { %15 = vsyncpa [#allocation4], 0  ;;  %s2242_s24 = smov [#allocation5]   ;;  %s2124_s28 = scalar_lea.hbm %s2401_s1, 2048 }
   0x4   :  { %s31_s25 = sshll.u32 %s2242_s24, 4  ;;  %p2125_p0 = scmp.ne.s32.totalorder %s2401_s1, %s2124_s28  ;;  %s32_s25 = int_to_ptr.vmem [resolvable:$true] %s31_s25 }
   0x5   :  { %p2128_p1 = scmp.lt.u32.totalorder %s2124_s28, %s2401_s1 }
   0x7   :  { %p2130_p2 = pnand %p2128_p1, %p2125_p0 }
   0x9   :  { %2133 = shalt.err (!%p2130_p2)
}
   0xa   :  { %s2134_s10 = scalar_lea.vmem %s32_s25, 2048  ;;  %p2139_p4 = scmp.lt.s32.totalorder %s32_s25, %s32_s25 }
   0xb   :  { %p2135_p3 = scmp.ne.s32.totalorder %s32_s25, %s2134_s10  ;;  %p2140_p5 = scmp.lt.s32.totalorder %s2134_s10, %s2134_s10 }
   0xd   :  { %p2141_p6 = por %p2140_p5, %p2139_p4 }
   0xf   :  { %p2142_p7 = pnand %p2141_p6, %p2135_p3 }
  0x11   :  { %2145 = shalt.err (!%p2142_p7)
}
  0x12   :  { %s2243_s11 = smov 256   ;;  %s2244_s12 = smov 16  }
  0x13   :  { %37 = dma.hbm_to_vmem [thread:$0]  %s2401_s1, 2048, %s32_s25, [#allocation6], %s2243_s11, %s2243_s11, %s2244_s12  }
  0x14   :  { %s2245_s15 = smov [#allocation2]   ;;  %s2246_s17 = smov [#allocation7]  }
  0x15   :  { %s22_s16 = sshll.u32 %s2245_s15, 4  ;;  %s45_s18 = sshll.u32 %s2246_s17, 4  ;;  %s23_s16 = int_to_ptr.vmem [resolvable:$true] %s22_s16  ;;  %s46_s18 = int_to_ptr.vmem [resolvable:$true] %s45_s18 }
  0x16   :  { %s2146_s21 = scalar_lea.hbm %s2400_s0, 128 }
  0x17   :  { %p2147_p8 = scmp.ne.s32.totalorder %s2400_s0, %s2146_s21  ;;  %p2150_p9 = scmp.lt.u32.totalorder %s2146_s21, %s2400_s0 }
  0x19   :  { %p2152_p10 = pnand %p2150_p9, %p2147_p8 }
  0x1b   :  { %2155 = shalt.err (!%p2152_p10)
}
  0x1c   :  { %s2156_s1 = scalar_lea.vmem %s23_s16, 128  ;;  %p2161_p12 = scmp.lt.s32.totalorder %s23_s16, %s23_s16 }
  0x1d   :  { %p2157_p11 = scmp.ne.s32.totalorder %s23_s16, %s2156_s1  ;;  %p2162_p13 = scmp.lt.s32.totalorder %s2156_s1, %s2156_s1 }
  0x1f   :  { %p2163_p0 = por %p2162_p13, %p2161_p12 }
  0x21   :  { %p2164_p1 = pnand %p2163_p0, %p2157_p11 }
  0x23   :  { %2167 = shalt.err (!%p2164_p1)
}
  0x24   :  { %25 = dma.hbm_to_vmem [thread:$0]  %s2400_s0, 128, %s23_s16, [#allocation3]  }
  0x25   :  { %s2168_s30 = scalar_lea.hbm %s2403_s3, 16384 }
  0x26   :  { %p2169_p2 = scmp.ne.s32.totalorder %s2403_s3, %s2168_s30  ;;  %p2172_p3 = scmp.lt.u32.totalorder %s2168_s30, %s2403_s3 }
  0x28   :  { %p2174_p4 = pnand %p2172_p3, %p2169_p2 }
  0x2a   :  { %2177 = shalt.err (!%p2174_p4)
}
  0x2b   :  { %s2178_s14 = scalar_lea.vmem %s46_s18, 16384  ;;  %p2183_p6 = scmp.lt.s32.totalorder %s46_s18, %s46_s18 }
  0x2c   :  { %p2179_p5 = scmp.ne.s32.totalorder %s46_s18, %s2178_s14  ;;  %p2184_p7 = scmp.lt.s32.totalorder %s2178_s14, %s2178_s14 }
  0x2e   :  { %p2185_p8 = por %p2184_p7, %p2183_p6 }
  0x30   :  { %p2186_p9 = pnand %p2185_p8, %p2179_p5 }
  0x32   :  { %2189 = shalt.err (!%p2186_p9)
}
  0x33   :  { %51 = dma.hbm_to_vmem [thread:$0]  %s2403_s3, 16384, %s46_s18, [#allocation6], %s2243_s11, %s2243_s11, %s2244_s12  }
  0x34   :  { %s2247_s16 = smov [#allocation8]   ;;  %s2190_s21 = scalar_lea.hbm %s2405_s5, 4096 }
  0x35   :  { %s59_s17 = sshll.u32 %s2247_s16, 4  ;;  %p2191_p10 = scmp.ne.s32.totalorder %s2405_s5, %s2190_s21  ;;  %s60_s17 = int_to_ptr.vmem [resolvable:$true] %s59_s17 }
  0x36   :  { %p2194_p11 = scmp.lt.u32.totalorder %s2190_s21, %s2405_s5 }
  0x38   :  { %p2196_p12 = pnand %p2194_p11, %p2191_p10 }
  0x3a   :  { %2199 = shalt.err (!%p2196_p12)
}
  0x3b   :  { %s2200_s1 = scalar_lea.vmem %s60_s17, 4096  ;;  %p2205_p0 = scmp.lt.s32.totalorder %s60_s17, %s60_s17 }
  0x3c   :  { %p2201_p13 = scmp.ne.s32.totalorder %s60_s17, %s2200_s1  ;;  %p2206_p1 = scmp.lt.s32.totalorder %s2200_s1, %s2200_s1 }
  0x3e   :  { %p2207_p2 = por %p2206_p1, %p2205_p0 }
  0x40   :  { %p2208_p3 = pnand %p2207_p2, %p2201_p13 }
  0x42   :  { %2211 = shalt.err (!%p2208_p3)
}
  0x43   :  { %s2248_s3 = smov 64   ;;  %s2249_s11 = smov 4  }
  0x44   :  { %65 = dma.hbm_to_vmem [thread:$0]  %s2405_s5, 4096, %s60_s17, [#allocation9], %s2248_s3, %s2248_s3, %s2249_s11  }
  0x45   :  { %2234 = dma.done.wait [#allocation3], 128  }
  0x46   :  { %2235 = vsyncadd [#allocation3], 4294967168 }
  0x47   :  { %2236 = dma.done.wait [#allocation6], 18432  }
  0x48   :  { %2237 = vsyncadd [#allocation6], 4294948864 }
  0x49   :  { %2238 = dma.done.wait [#allocation9], 4096  }
  0x4a   :  { %2239 = vsyncadd [#allocation9], 4294963200  ;;  %v2250_v0 = vmov 0   ;;  %v1872_v1 = vld [vmem:[#allocation5 + $0x4] ss:$16 sps:$4 sm:$0xff]   ;;  %v81_v14 = vld [vmem:[#allocation2] sm:$0xff] }
  0x4b   :  { %237 = vmatprep.mubr.bf16.mxu0 %v2250_v0  ;;  %278 = vmatprep.mubr.bf16.mxu1 %v2250_v0  ;;  %v1874_v2 = vld [vmem:[#allocation5] ss:$16 sps:$4 sm:$0xff]   ;;  %v1875_v3 = vld [vmem:[#allocation5 + $0x24] ss:$16 sps:$4 sm:$0xff]   ;;  %v1884_v7 = vld [vmem:[#allocation5 + $0xc] ss:$16 sps:$4 sm:$0xff]   ;;  %v82_v17 = vpack.c.bf16 %v81_v14, %v81_v14 }
  0x4c   :  { %205 = vmatprep.subr.bf16.mxu0 %v1872_v1  ;;  %v1877_v4 = vld [vmem:[#allocation5 + $0x20] ss:$16 sps:$4 sm:$0xff]   ;;  %v1878_v5 = vld [vmem:[#allocation5 + $0x44] ss:$16 sps:$4 sm:$0xff]   ;;  %v1886_v8 = vld [vmem:[#allocation5 + $0x8] ss:$16 sps:$4 sm:$0xff]   ;;  %246 = vmatprep.subr.bf16.mxu1 %v1884_v7 }
  0x4d   :  { %206 = vmatpush1.bf16.msra.mxu0 %v1874_v2  ;;  %v1880_v6 = vld [vmem:[#allocation5 + $0x40] ss:$16 sps:$4 sm:$0xff]   ;;  %v1887_v9 = vld [vmem:[#allocation5 + $0x2c] ss:$16 sps:$4 sm:$0xff]   ;;  %v1881_v10 = vld [vmem:[#allocation5 + $0x64] ss:$16 sps:$4 sm:$0xff]   ;;  %247 = vmatpush1.bf16.msra.mxu1 %v1886_v8 }
  0x4e   :  { %207 = vmatprep.subr.bf16.mxu0 %v1875_v3  ;;  %v1889_v11 = vld [vmem:[#allocation5 + $0x28] ss:$16 sps:$4 sm:$0xff]   ;;  %v1883_v12 = vld [vmem:[#allocation5 + $0x60] ss:$16 sps:$4 sm:$0xff]   ;;  %248 = vmatprep.subr.bf16.mxu1 %v1887_v9  ;;  %v1890_v13 = vld [vmem:[#allocation5 + $0x4c] ss:$16 sps:$4 sm:$0xff]  }
  0x4f   :  { %v1898_v15 = vld [vmem:[#allocation7 + $0x4] ss:$16 sps:$4 sm:$0xff]   ;;  %v1892_v16 = vld [vmem:[#allocation5 + $0x48] ss:$16 sps:$4 sm:$0xff]   ;;  %v1893_v18 = vld [vmem:[#allocation5 + $0x6c] ss:$16 sps:$4 sm:$0xff]  }
  0x50   :  { %vm201_vm0 = vcmask 523264   ;;  %v1896_v19 = vld [vmem:[#allocation7] ss:$16 sps:$4 sm:$0xff]   ;;  %v1904_v20 = vld [vmem:[#allocation7 + $0x24] ss:$16 sps:$4 sm:$0xff]  }
  0x51   :  { %208 = vmatpush1.bf16.msra.mxu0 %v1877_v4  ;;  %249 = vmatpush1.bf16.msra.mxu1 %v1889_v11  ;;  %v1895_v21 = vld [vmem:[#allocation5 + $0x68] ss:$16 sps:$4 sm:$0xff]   ;;  %v1901_v22 = vld [vmem:[#allocation7 + $0xc] ss:$16 sps:$4 sm:$0xff]   ;;  %v1902_v23 = vld [vmem:[#allocation7 + $0x20] ss:$16 sps:$4 sm:$0xff]  }
  0x52   :  { %209 = vmatprep.subr.bf16.mxu0 %v1878_v5  ;;  %250 = vmatprep.subr.bf16.mxu1 %v1890_v13  ;;  %v1910_v24 = vld [vmem:[#allocation7 + $0x44] ss:$16 sps:$4 sm:$0xff]   ;;  %v1899_v25 = vld [vmem:[#allocation7 + $0x8] ss:$16 sps:$4 sm:$0xff]   ;;  %v1907_v26 = vld [vmem:[#allocation7 + $0x2c] ss:$16 sps:$4 sm:$0xff]  }
  0x53   :  { %v1908_v27 = vld [vmem:[#allocation7 + $0x40] ss:$16 sps:$4 sm:$0xff]   ;;  %v1916_v28 = vld [vmem:[#allocation7 + $0x64] ss:$16 sps:$4 sm:$0xff]   ;;  %v1905_v29 = vld [vmem:[#allocation7 + $0x28] ss:$16 sps:$4 sm:$0xff]  }
  0x54   :  { %v1913_v30 = vld [vmem:[#allocation7 + $0x4c] ss:$16 sps:$4 sm:$0xff]   ;;  %v1914_v31 = vld [vmem:[#allocation7 + $0x60] ss:$16 sps:$4 sm:$0xff]   ;;  %v1922_v32 = vld [vmem:[#allocation7 + $0x84] ss:$16 sps:$4 sm:$0xff]  }
  0x55   :  { %210 = vmatpush1.bf16.msra.mxu0 %v1880_v6  ;;  %251 = vmatpush1.bf16.msra.mxu1 %v1892_v16  ;;  %v1911_v33 = vld [vmem:[#allocation7 + $0x48] ss:$16 sps:$4 sm:$0xff]   ;;  %v1919_v34 = vld [vmem:[#allocation7 + $0x6c] ss:$16 sps:$4 sm:$0xff]   ;;  %v1920_v35 = vld [vmem:[#allocation7 + $0x80] ss:$16 sps:$4 sm:$0xff]  }
  0x56   :  { %211 = vmatprep.subr.bf16.mxu0 %v1881_v10  ;;  %252 = vmatprep.subr.bf16.mxu1 %v1893_v18  ;;  %v1928_v36 = vld [vmem:[#allocation7 + $0xa4] ss:$16 sps:$4 sm:$0xff]   ;;  %v1917_v37 = vld [vmem:[#allocation7 + $0x68] ss:$16 sps:$4 sm:$0xff]   ;;  %v1925_v38 = vld [vmem:[#allocation7 + $0x8c] ss:$16 sps:$4 sm:$0xff]  }
  0x57   :  { %v1926_v39 = vld [vmem:[#allocation7 + $0xa0] ss:$16 sps:$4 sm:$0xff]   ;;  %v1934_v40 = vld [vmem:[#allocation7 + $0xc4] ss:$16 sps:$4 sm:$0xff]   ;;  %v1923_v41 = vld [vmem:[#allocation7 + $0x88] ss:$16 sps:$4 sm:$0xff]  }
  0x58   :  { %v1931_v42 = vld [vmem:[#allocation7 + $0xac] ss:$16 sps:$4 sm:$0xff]   ;;  %v1932_v43 = vld [vmem:[#allocation7 + $0xc0] ss:$16 sps:$4 sm:$0xff]   ;;  %v1940_v44 = vld [vmem:[#allocation7 + $0xe4] ss:$16 sps:$4 sm:$0xff]  }
  0x59   :  { %212 = vmatpush1.bf16.msra.mxu0 %v1883_v12  ;;  %253 = vmatpush1.bf16.msra.mxu1 %v1895_v21  ;;  %v1929_v45 = vld [vmem:[#allocation7 + $0xa8] ss:$16 sps:$4 sm:$0xff]   ;;  %v1937_v46 = vld [vmem:[#allocation7 + $0xcc] ss:$16 sps:$4 sm:$0xff]   ;;  %v1938_v47 = vld [vmem:[#allocation7 + $0xe0] ss:$16 sps:$4 sm:$0xff]   ;;  %v101_v21 = vlaneseq }
  0x5a   :  { %1085 = vmatprep.subr.bf16.mxu0 %v1898_v15  ;;  %1167 = vmatprep.subr.bf16.mxu1 %v1901_v22  ;;  %v1946_v48 = vld [vmem:[#allocation7 + $0x104] ss:$16 sps:$4 sm:$0xff]   ;;  %v1935_v49 = vld [vmem:[#allocation7 + $0xc8] ss:$16 sps:$4 sm:$0xff]   ;;  %v1943_v50 = vld [vmem:[#allocation7 + $0xec] ss:$16 sps:$4 sm:$0xff]  }
  0x5b   :  { %v1941_v51 = vld [vmem:[#allocation7 + $0xe8] ss:$16 sps:$4 sm:$0xff]   ;;  %v1944_v52 = vld [vmem:[#allocation7 + $0x100] ss:$16 sps:$4 sm:$0xff]   ;;  %v1949_v53 = vld [vmem:[#allocation7 + $0x10c] ss:$16 sps:$4 sm:$0xff]  }
  0x5c   :  { %1643 = vmatmul.mubr.msk.bf16.vlgmr.msra.gmra.mrb[0].mxu0 %vm201_vm0, %v82_v17  ;;  %1644 = vmatmul.mubr.msk.bf16.vlgmr.msra.gmra.mrb[0].mxu1 %vm201_vm0, %v82_v17  ;;  %v1952_v54 = vld [vmem:[#allocation7 + $0x124] ss:$16 sps:$4 sm:$0xff]   ;;  %v1950_v55 = vld [vmem:[#allocation7 + $0x120] ss:$16 sps:$4 sm:$0xff]   ;;  %v1947_v57 = vld [vmem:[#allocation7 + $0x108] ss:$16 sps:$4 sm:$0xff]  }
  0x5d   :  { %1086 = vmatpush1.bf16.msra.mxu0 %v1896_v19  ;;  %1168 = vmatpush1.bf16.msra.mxu1 %v1899_v25  ;;  %v1958_v56 = vld [vmem:[#allocation7 + $0x144] ss:$16 sps:$4 sm:$0xff]   ;;  %v1955_v58 = vld [vmem:[#allocation7 + $0x12c] ss:$16 sps:$4 sm:$0xff]   ;;  %v1956_v59 = vld [vmem:[#allocation7 + $0x140] ss:$16 sps:$4 sm:$0xff]  }
  0x5e   :  { %1087 = vmatprep.subr.bf16.mxu0 %v1904_v20  ;;  %1169 = vmatprep.subr.bf16.mxu1 %v1907_v26  ;;  %v1964_v60 = vld [vmem:[#allocation7 + $0x164] ss:$16 sps:$4 sm:$0xff]   ;;  %v1953_v61 = vld [vmem:[#allocation7 + $0x128] ss:$16 sps:$4 sm:$0xff]   ;;  %v1961_v62 = vld [vmem:[#allocation7 + $0x14c] ss:$16 sps:$4 sm:$0xff]  }
  0x5f   :  { %v1962_v63 = vld [vmem:[#allocation7 + $0x160] ss:$16 sps:$4 sm:$0xff]   ;;  %v1970_v0 = vld [vmem:[#allocation7 + $0x184] ss:$16 sps:$4 sm:$0xff]   ;;  %v1959_v1 = vld [vmem:[#allocation7 + $0x148] ss:$16 sps:$4 sm:$0xff]  }
  0x60   :  { %v1967_v2 = vld [vmem:[#allocation7 + $0x16c] ss:$16 sps:$4 sm:$0xff]   ;;  %v1968_v3 = vld [vmem:[#allocation7 + $0x180] ss:$16 sps:$4 sm:$0xff]   ;;  %v1976_v4 = vld [vmem:[#allocation7 + $0x1a4] ss:$16 sps:$4 sm:$0xff]  }
  0x61   :  { %1088 = vmatpush1.bf16.msra.mxu0 %v1902_v23  ;;  %1170 = vmatpush1.bf16.msra.mxu1 %v1905_v29  ;;  %v1965_v5 = vld [vmem:[#allocation7 + $0x168] ss:$16 sps:$4 sm:$0xff]   ;;  %v1973_v6 = vld [vmem:[#allocation7 + $0x18c] ss:$16 sps:$4 sm:$0xff]   ;;  %v1974_v7 = vld [vmem:[#allocation7 + $0x1a0] ss:$16 sps:$4 sm:$0xff]  }
  0x62   :  { %1089 = vmatprep.subr.bf16.mxu0 %v1910_v24  ;;  %1171 = vmatprep.subr.bf16.mxu1 %v1913_v30  ;;  %v1971_v8 = vld [vmem:[#allocation7 + $0x188] ss:$16 sps:$4 sm:$0xff]   ;;  %v1979_v9 = vld [vmem:[#allocation7 + $0x1ac] ss:$16 sps:$4 sm:$0xff]   ;;  %v1982_v11 = vld [vmem:[#allocation7 + $0x1c4] ss:$16 sps:$4 sm:$0xff]  }
  0x63   :  { %v1977_v10 = vld [vmem:[#allocation7 + $0x1a8] ss:$16 sps:$4 sm:$0xff]   ;;  %v1985_v12 = vld [vmem:[#allocation7 + $0x1cc] ss:$16 sps:$4 sm:$0xff]   ;;  %v1980_v13 = vld [vmem:[#allocation7 + $0x1c0] ss:$16 sps:$4 sm:$0xff]  }
  0x64   :  { %v1983_v14 = vld [vmem:[#allocation7 + $0x1c8] ss:$16 sps:$4 sm:$0xff]   ;;  %v1988_v15 = vld [vmem:[#allocation7 + $0x1e4] ss:$16 sps:$4 sm:$0xff]   ;;  %v1991_v16 = vld [vmem:[#allocation7 + $0x1ec] ss:$16 sps:$4 sm:$0xff]  }
  0x65   :  { %1090 = vmatpush1.bf16.msra.mxu0 %v1908_v27  ;;  %1172 = vmatpush1.bf16.msra.mxu1 %v1911_v33  ;;  %v1986_v17 = vld [vmem:[#allocation7 + $0x1e0] ss:$16 sps:$4 sm:$0xff]   ;;  %v1989_v18 = vld [vmem:[#allocation7 + $0x1e8] ss:$16 sps:$4 sm:$0xff]   ;;  %v1994_v19 = vld [vmem:[#allocation7 + $0x204] ss:$16 sps:$4 sm:$0xff]  }
  0x66   :  { %1091 = vmatprep.subr.bf16.mxu0 %v1916_v28  ;;  %1173 = vmatprep.subr.bf16.mxu1 %v1919_v34  ;;  %v1997_v20 = vld [vmem:[#allocation7 + $0x20c] ss:$16 sps:$4 sm:$0xff]   ;;  %v2348_v22 = vshrl.u32 %v101_v21, 7  ;;  %v2354_v24 = vld [vmem:[%s2402_s2] sm:$0xf] }
  0x67   :  { %v2054_v21 = vld [vmem:[#allocation7 + $0x344] ss:$16 sps:$4 sm:$0xff]  }
  0x68   :  { %v103_v23 = vsub.s32 0, %v2348_v22  ;;  %v107_v25 = vsub.s32 1, %v2348_v22  ;;  %v115_v29 = vsub.s32 3, %v2348_v22 }
  0x69   :  { %1092 = vmatpush1.bf16.msra.mxu0 %v1914_v31  ;;  %1174 = vmatpush1.bf16.msra.mxu1 %v1917_v37 }
  0x6a   :  { %1093 = vmatprep.subr.bf16.mxu0 %v1922_v32  ;;  %1175 = vmatprep.subr.bf16.mxu1 %v1925_v38  ;;  %v104_v26 = vrot.slane %v2354_v24, %v103_v23  ;;  %v108_v27 = vrot.slane %v2354_v24, %v107_v25  ;;  %v116_v37 = vrot.slane %v2354_v24, %v115_v29 }
  0x6d   :  { %1094 = vmatpush1.bf16.msra.mxu0 %v1920_v35  ;;  %1176 = vmatpush1.bf16.msra.mxu1 %v1923_v41 }
  0x6e   :  { %1095 = vmatprep.subr.bf16.mxu0 %v1928_v36  ;;  %1177 = vmatprep.subr.bf16.mxu1 %v1931_v42 }
  0x71   :  { %1096 = vmatpush1.bf16.msra.mxu0 %v1926_v39  ;;  %1178 = vmatpush1.bf16.msra.mxu1 %v1929_v45  ;;  %v1992_v39 = vld [vmem:[#allocation7 + $0x200] ss:$16 sps:$4 sm:$0xff]  }
  0x72   :  { %1097 = vmatprep.subr.bf16.mxu0 %v1934_v40  ;;  %1179 = vmatprep.subr.bf16.mxu1 %v1937_v46  ;;  %v1995_v40 = vld [vmem:[#allocation7 + $0x208] ss:$16 sps:$4 sm:$0xff]  }
  0x75   :  { %1098 = vmatpush1.bf16.msra.mxu0 %v1932_v43  ;;  %1180 = vmatpush1.bf16.msra.mxu1 %v1935_v49  ;;  %v2000_v43 = vld [vmem:[#allocation7 + $0x224] ss:$16 sps:$4 sm:$0xff]   ;;  %v1998_v49 = vld [vmem:[#allocation7 + $0x220] ss:$16 sps:$4 sm:$0xff]  }
  0x76   :  { %1099 = vmatprep.subr.bf16.mxu0 %v1940_v44  ;;  %1181 = vmatprep.subr.bf16.mxu1 %v1943_v50  ;;  %v2003_v44 = vld [vmem:[#allocation7 + $0x22c] ss:$16 sps:$4 sm:$0xff]   ;;  %v2001_v50 = vld [vmem:[#allocation7 + $0x228] ss:$16 sps:$4 sm:$0xff]  }
  0x79   :  { %1100 = vmatpush1.bf16.msra.mxu0 %v1938_v47  ;;  %1182 = vmatpush1.bf16.msra.mxu1 %v1941_v51 }
  0x7a   :  { %1101 = vmatprep.subr.bf16.mxu0 %v1946_v48  ;;  %1183 = vmatprep.subr.bf16.mxu1 %v1949_v53  ;;  %v2009_v53 = vld [vmem:[#allocation7 + $0x24c] ss:$16 sps:$4 sm:$0xff]  }
  0x7d   :  { %1102 = vmatpush1.bf16.msra.mxu0 %v1944_v52  ;;  %1184 = vmatpush1.bf16.msra.mxu1 %v1947_v57  ;;  %v2006_v52 = vld [vmem:[#allocation7 + $0x244] ss:$16 sps:$4 sm:$0xff]  }
  0x7e   :  { %1103 = vmatprep.subr.bf16.mxu0 %v1952_v54  ;;  %1185 = vmatprep.subr.bf16.mxu1 %v1955_v58  ;;  %v2012_v57 = vld [vmem:[#allocation7 + $0x264] ss:$16 sps:$4 sm:$0xff]   ;;  %v2015_v58 = vld [vmem:[#allocation7 + $0x26c] ss:$16 sps:$4 sm:$0xff]  }
  0x81   :  { %1104 = vmatpush1.bf16.msra.mxu0 %v1950_v55  ;;  %1186 = vmatpush1.bf16.msra.mxu1 %v1953_v61  ;;  %v2004_v55 = vld [vmem:[#allocation7 + $0x240] ss:$16 sps:$4 sm:$0xff]   ;;  %v2018_v61 = vld [vmem:[#allocation7 + $0x284] ss:$16 sps:$4 sm:$0xff]  }
  0x82   :  { %1105 = vmatprep.subr.bf16.mxu0 %v1958_v56  ;;  %1187 = vmatprep.subr.bf16.mxu1 %v1961_v62  ;;  %v2007_v56 = vld [vmem:[#allocation7 + $0x248] ss:$16 sps:$4 sm:$0xff]   ;;  %v2021_v62 = vld [vmem:[#allocation7 + $0x28c] ss:$16 sps:$4 sm:$0xff]  }
  0x85   :  { %1106 = vmatpush1.bf16.msra.mxu0 %v1956_v59  ;;  %1188 = vmatpush1.bf16.msra.mxu1 %v1959_v1  ;;  %v2010_v59 = vld [vmem:[#allocation7 + $0x260] ss:$16 sps:$4 sm:$0xff]   ;;  %v2024_v1 = vld [vmem:[#allocation7 + $0x2a4] ss:$16 sps:$4 sm:$0xff]  }
  0x86   :  { %1107 = vmatprep.subr.bf16.mxu0 %v1964_v60  ;;  %1189 = vmatprep.subr.bf16.mxu1 %v1967_v2  ;;  %v2013_v60 = vld [vmem:[#allocation7 + $0x268] ss:$16 sps:$4 sm:$0xff]   ;;  %v2027_v2 = vld [vmem:[#allocation7 + $0x2ac] ss:$16 sps:$4 sm:$0xff]  }
  0x89   :  { %1108 = vmatpush1.bf16.msra.mxu0 %v1962_v63  ;;  %1190 = vmatpush1.bf16.msra.mxu1 %v1965_v5  ;;  %v2016_v63 = vld [vmem:[#allocation7 + $0x280] ss:$16 sps:$4 sm:$0xff]   ;;  %v2030_v5 = vld [vmem:[#allocation7 + $0x2c4] ss:$16 sps:$4 sm:$0xff]  }
  0x8a   :  { %1109 = vmatprep.subr.bf16.mxu0 %v1970_v0  ;;  %1191 = vmatprep.subr.bf16.mxu1 %v1973_v6  ;;  %v2019_v0 = vld [vmem:[#allocation7 + $0x288] ss:$16 sps:$4 sm:$0xff]   ;;  %v2033_v6 = vld [vmem:[#allocation7 + $0x2cc] ss:$16 sps:$4 sm:$0xff]  }
  0x8d   :  { %1110 = vmatpush1.bf16.msra.mxu0 %v1968_v3  ;;  %1192 = vmatpush1.bf16.msra.mxu1 %v1971_v8  ;;  %v2022_v3 = vld [vmem:[#allocation7 + $0x2a0] ss:$16 sps:$4 sm:$0xff]   ;;  %v2031_v8 = vld [vmem:[#allocation7 + $0x2c8] ss:$16 sps:$4 sm:$0xff]  }
  0x8e   :  { %1111 = vmatprep.subr.bf16.mxu0 %v1976_v4  ;;  %1193 = vmatprep.subr.bf16.mxu1 %v1979_v9  ;;  %v2025_v4 = vld [vmem:[#allocation7 + $0x2a8] ss:$16 sps:$4 sm:$0xff]   ;;  %v2036_v9 = vld [vmem:[#allocation7 + $0x2e4] ss:$16 sps:$4 sm:$0xff]  }
  0x91   :  { %1112 = vmatpush1.bf16.msra.mxu0 %v1974_v7  ;;  %1194 = vmatpush1.bf16.msra.mxu1 %v1977_v10  ;;  %v2028_v7 = vld [vmem:[#allocation7 + $0x2c0] ss:$16 sps:$4 sm:$0xff]   ;;  %v2039_v10 = vld [vmem:[#allocation7 + $0x2ec] ss:$16 sps:$4 sm:$0xff]  }
  0x92   :  { %1113 = vmatprep.subr.bf16.mxu0 %v1982_v11  ;;  %1195 = vmatprep.subr.bf16.mxu1 %v1985_v12  ;;  %v2034_v11 = vld [vmem:[#allocation7 + $0x2e0] ss:$16 sps:$4 sm:$0xff]   ;;  %v2037_v12 = vld [vmem:[#allocation7 + $0x2e8] ss:$16 sps:$4 sm:$0xff]  }
  0x95   :  { %1114 = vmatpush1.bf16.msra.mxu0 %v1980_v13  ;;  %1196 = vmatpush1.bf16.msra.mxu1 %v1983_v14  ;;  %v2042_v13 = vld [vmem:[#allocation7 + $0x304] ss:$16 sps:$4 sm:$0xff]   ;;  %v2045_v14 = vld [vmem:[#allocation7 + $0x30c] ss:$16 sps:$4 sm:$0xff]  }
  0x96   :  { %1115 = vmatprep.subr.bf16.mxu0 %v1988_v15  ;;  %1197 = vmatprep.subr.bf16.mxu1 %v1991_v16  ;;  %v2040_v15 = vld [vmem:[#allocation7 + $0x300] ss:$16 sps:$4 sm:$0xff]   ;;  %v2043_v16 = vld [vmem:[#allocation7 + $0x308] ss:$16 sps:$4 sm:$0xff]  }
  0x99   :  { %1116 = vmatpush1.bf16.msra.mxu0 %v1986_v17  ;;  %1198 = vmatpush1.bf16.msra.mxu1 %v1989_v18  ;;  %v2048_v17 = vld [vmem:[#allocation7 + $0x324] ss:$16 sps:$4 sm:$0xff]   ;;  %v2051_v18 = vld [vmem:[#allocation7 + $0x32c] ss:$16 sps:$4 sm:$0xff]  }
  0x9a   :  { %1126 = vmatprep.subr.bf16.mxu0 %v1994_v19  ;;  %1208 = vmatprep.subr.bf16.mxu1 %v1997_v20  ;;  %v2046_v19 = vld [vmem:[#allocation7 + $0x320] ss:$16 sps:$4 sm:$0xff]   ;;  %v2049_v20 = vld [vmem:[#allocation7 + $0x328] ss:$16 sps:$4 sm:$0xff]  }
 0x12f   :  { %v239_v28 = vpop.f32.mrb[0].mxu0  ;;  %v2367_v41 = vpop.f32.mrb[0].mxu1 }
 0x130   :  { %v240_v30 = vadd.f32 %v239_v28, %v104_v26  ;;  %v241_v31 = vpop.f32.mrb[1].mxu0  ;;  %v282_v45 = vpop.f32.mrb[1].mxu1  ;;  %v2057_v26 = vld [vmem:[#allocation7 + $0x34c] ss:$16 sps:$4 sm:$0xff]   ;;  %v2055_v28 = vld [vmem:[#allocation7 + $0x348] ss:$16 sps:$4 sm:$0xff]  }
 0x131   :  { %v242_v32 = vadd.f32 %v241_v31, %v108_v27  ;;  %v243_v33 = vpop.f32.mrb[2].mxu0  ;;  %v283_v46 = vadd.f32 %v282_v45, %v116_v37  ;;  %v284_v47 = vpop.f32.mrb[2].mxu1  ;;  %v2052_v27 = vld [vmem:[#allocation7 + $0x340] ss:$16 sps:$4 sm:$0xff]   ;;  %v2063_v31 = vld [vmem:[#allocation7 + $0x36c] ss:$16 sps:$4 sm:$0xff]  }
 0x132   :  { %v287_v34 = vmax.f32 %v240_v30, 0.0  ;;  %v244_v35 = vpop.f32.mrb[3].mxu0  ;;  %v285_v48 = vpop.f32.mrb[3].mxu1  ;;  %v2060_v30 = vld [vmem:[#allocation7 + $0x364] ss:$16 sps:$4 sm:$0xff]  }
 0x133   :  { %v288_v36 = vmax.f32 %v242_v32, 0.0  ;;  %v290_v51 = vmax.f32 %v283_v46, 0.0  ;;  %v2058_v32 = vld [vmem:[#allocation7 + $0x360] ss:$16 sps:$4 sm:$0xff]   ;;  %v2061_v33 = vld [vmem:[#allocation7 + $0x368] ss:$16 sps:$4 sm:$0xff]  }
 0x134   :  { %v291_v42 = vpack.c.bf16 %v287_v34, %v287_v34  ;;  %v2066_v34 = vld [vmem:[#allocation7 + $0x384] ss:$16 sps:$4 sm:$0xff]   ;;  %v2069_v35 = vld [vmem:[#allocation7 + $0x38c] ss:$16 sps:$4 sm:$0xff]   ;;  %v2067_v37 = vld [vmem:[#allocation7 + $0x388] ss:$16 sps:$4 sm:$0xff]  }
 0x135   :  { %v292_v38 = vpack.c.bf16 %v288_v36, %v288_v36  ;;  %v294_v54 = vpack.c.bf16 %v290_v51, %v290_v51  ;;  %v2064_v36 = vld [vmem:[#allocation7 + $0x380] ss:$16 sps:$4 sm:$0xff]   ;;  %v2078_v45 = vld [vmem:[#allocation7 + $0x3c4] ss:$16 sps:$4 sm:$0xff]   ;;  %v2081_v46 = vld [vmem:[#allocation7 + $0x3cc] ss:$16 sps:$4 sm:$0xff]  }
 0x136   :  { %v2076_v47 = vld [vmem:[#allocation7 + $0x3c0] ss:$16 sps:$4 sm:$0xff]   ;;  %v2079_v48 = vld [vmem:[#allocation7 + $0x3c8] ss:$16 sps:$4 sm:$0xff]   ;;  %v2087_v51 = vld [vmem:[#allocation7 + $0x3ec] ss:$16 sps:$4 sm:$0xff]  }
 0x137   :  { %1117 = vmatprep.mubr.bf16.mxu0 %v292_v38  ;;  %1199 = vmatprep.mubr.bf16.mxu1 %v292_v38  ;;  %v111_v38 = vsub.s32 2, %v2348_v22 }
 0x138   :  { %1118 = vmatmul.mubr.bf16.vlgmr.msra.gmra.mrb[4].mxu0 %v291_v42  ;;  %1200 = vmatmul.mubr.bf16.vlgmr.msra.gmra.mrb[4].mxu1 %v291_v42  ;;  %v2070_v42 = vld [vmem:[#allocation7 + $0x3a0] ss:$16 sps:$4 sm:$0xff]  }
 0x139   :  { %1127 = vmatpush1.bf16.msra.mxu0 %v1992_v39  ;;  %1209 = vmatpush1.bf16.msra.mxu1 %v1995_v40  ;;  %v2072_v39 = vld [vmem:[#allocation7 + $0x3a4] ss:$16 sps:$4 sm:$0xff]   ;;  %v2075_v40 = vld [vmem:[#allocation7 + $0x3ac] ss:$16 sps:$4 sm:$0xff]  }
 0x13a   :  { %1128 = vmatprep.subr.bf16.mxu0 %v2000_v43  ;;  %1210 = vmatprep.subr.bf16.mxu1 %v2003_v44  ;;  %v2073_v43 = vld [vmem:[#allocation7 + $0x3a8] ss:$16 sps:$4 sm:$0xff]   ;;  %v112_v44 = vrot.slane %v2354_v24, %v111_v38  ;;  %v2088_v24 = vld [vmem:[#allocation8 + $0x40] sm:$0xff]  }
 0x13b   :  { %1158 = vmatprep.mubr.bf16.mxu0 %v294_v54  ;;  %1240 = vmatprep.mubr.bf16.mxu1 %v294_v54 }
 0x13d   :  { %1129 = vmatpush1.bf16.msra.mxu0 %v1998_v49  ;;  %1211 = vmatpush1.bf16.msra.mxu1 %v2001_v50  ;;  %v281_v49 = vadd.f32 %v2367_v41, %v112_v44  ;;  %v2084_v50 = vld [vmem:[#allocation7 + $0x3e4] ss:$16 sps:$4 sm:$0xff]   ;;  %v2092_v41 = vld [vmem:[#allocation8 + $0x48] sm:$0xff]  }
 0x13e   :  { %1130 = vmatprep.subr.bf16.mxu0 %v2006_v52  ;;  %1212 = vmatprep.subr.bf16.mxu1 %v2009_v53  ;;  %v2082_v52 = vld [vmem:[#allocation7 + $0x3e0] ss:$16 sps:$4 sm:$0xff]   ;;  %v2085_v53 = vld [vmem:[#allocation7 + $0x3e8] ss:$16 sps:$4 sm:$0xff]  }
 0x13f   :  { %v289_v54 = vmax.f32 %v281_v49, 0.0 }
 0x141   :  { %1131 = vmatpush1.bf16.msra.mxu0 %v2004_v55  ;;  %1213 = vmatpush1.bf16.msra.mxu1 %v2007_v56  ;;  %v2089_v55 = vld [vmem:[#allocation8 + $0xc0] sm:$0xff]  }
 0x142   :  { %1132 = vmatprep.subr.bf16.mxu0 %v2012_v57  ;;  %1214 = vmatprep.subr.bf16.mxu1 %v2015_v58  ;;  %v2090_v56 = vld [vmem:[#allocation8] sm:$0xff]   ;;  %v293_v58 = vpack.c.bf16 %v289_v54, %v289_v54 }
 0x143   :  { %v2091_v57 = vld [vmem:[#allocation8 + $0x80] sm:$0xff]  }
 0x145   :  { %1133 = vmatpush1.bf16.msra.mxu0 %v2010_v59  ;;  %1215 = vmatpush1.bf16.msra.mxu1 %v2013_v60  ;;  %v2093_v59 = vld [vmem:[#allocation8 + $0xc8] sm:$0xff]  }
 0x146   :  { %1134 = vmatprep.subr.bf16.mxu0 %v2018_v61  ;;  %1216 = vmatprep.subr.bf16.mxu1 %v2021_v62  ;;  %v2094_v60 = vld [vmem:[#allocation8 + $0x8] sm:$0xff]   ;;  %v2096_v62 = vld [vmem:[#allocation8 + $0x50] sm:$0xff]  }
 0x147   :  { %v2095_v61 = vld [vmem:[#allocation8 + $0x88] sm:$0xff]  }
 0x149   :  { %1135 = vmatpush1.bf16.msra.mxu0 %v2016_v63  ;;  %1217 = vmatpush1.bf16.msra.mxu1 %v2019_v0  ;;  %v2097_v63 = vld [vmem:[#allocation8 + $0xd0] sm:$0xff]  }
 0x14a   :  { %1136 = vmatprep.subr.bf16.mxu0 %v2024_v1  ;;  %1218 = vmatprep.subr.bf16.mxu1 %v2027_v2  ;;  %v2098_v0 = vld [vmem:[#allocation8 + $0x10] sm:$0xff]   ;;  %v2100_v2 = vld [vmem:[#allocation8 + $0x58] sm:$0xff]  }
 0x14b   :  { %v2099_v1 = vld [vmem:[#allocation8 + $0x90] sm:$0xff]  }
 0x14d   :  { %1137 = vmatpush1.bf16.msra.mxu0 %v2022_v3  ;;  %1219 = vmatpush1.bf16.msra.mxu1 %v2025_v4  ;;  %v2101_v3 = vld [vmem:[#allocation8 + $0xd8] sm:$0xff]  }
 0x14e   :  { %1138 = vmatprep.subr.bf16.mxu0 %v2030_v5  ;;  %1220 = vmatprep.subr.bf16.mxu1 %v2033_v6  ;;  %v2102_v4 = vld [vmem:[#allocation8 + $0x18] sm:$0xff]   ;;  %v2104_v6 = vld [vmem:[#allocation8 + $0x60] sm:$0xff]  }
 0x14f   :  { %v2103_v5 = vld [vmem:[#allocation8 + $0x98] sm:$0xff]  }
 0x151   :  { %1139 = vmatpush1.bf16.msra.mxu0 %v2028_v7  ;;  %1221 = vmatpush1.bf16.msra.mxu1 %v2031_v8  ;;  %v2105_v7 = vld [vmem:[#allocation8 + $0xe0] sm:$0xff]  }
 0x152   :  { %1140 = vmatprep.subr.bf16.mxu0 %v2036_v9  ;;  %1222 = vmatprep.subr.bf16.mxu1 %v2039_v10  ;;  %v2106_v8 = vld [vmem:[#allocation8 + $0x20] sm:$0xff]   ;;  %v2108_v10 = vld [vmem:[#allocation8 + $0x68] sm:$0xff]  }
 0x153   :  { %v2107_v9 = vld [vmem:[#allocation8 + $0xa0] sm:$0xff]  }
 0x155   :  { %1141 = vmatpush1.bf16.msra.mxu0 %v2034_v11  ;;  %1223 = vmatpush1.bf16.msra.mxu1 %v2037_v12  ;;  %v2109_v11 = vld [vmem:[#allocation8 + $0xe8] sm:$0xff]  }
 0x156   :  { %1142 = vmatprep.subr.bf16.mxu0 %v2042_v13  ;;  %1224 = vmatprep.subr.bf16.mxu1 %v2045_v14  ;;  %v2110_v12 = vld [vmem:[#allocation8 + $0x28] sm:$0xff]   ;;  %v2112_v14 = vld [vmem:[#allocation8 + $0x70] sm:$0xff]  }
 0x157   :  { %v2111_v13 = vld [vmem:[#allocation8 + $0xa8] sm:$0xff]  }
 0x159   :  { %1143 = vmatpush1.bf16.msra.mxu0 %v2040_v15  ;;  %1225 = vmatpush1.bf16.msra.mxu1 %v2043_v16  ;;  %v2113_v15 = vld [vmem:[#allocation8 + $0xf0] sm:$0xff]  }
 0x15a   :  { %1144 = vmatprep.subr.bf16.mxu0 %v2048_v17  ;;  %1226 = vmatprep.subr.bf16.mxu1 %v2051_v18  ;;  %v2114_v16 = vld [vmem:[#allocation8 + $0x30] sm:$0xff]   ;;  %v2116_v18 = vld [vmem:[#allocation8 + $0x78] sm:$0xff]  }
 0x15b   :  { %v2115_v17 = vld [vmem:[#allocation8 + $0xb0] sm:$0xff]  }
 0x15d   :  { %1145 = vmatpush1.bf16.msra.mxu0 %v2046_v19  ;;  %1227 = vmatpush1.bf16.msra.mxu1 %v2049_v20  ;;  %v2117_v19 = vld [vmem:[#allocation8 + $0xf8] sm:$0xff]  }
 0x15e   :  { %1146 = vmatprep.subr.bf16.mxu0 %v2054_v21  ;;  %1228 = vmatprep.subr.bf16.mxu1 %v2057_v26  ;;  %v2118_v20 = vld [vmem:[#allocation8 + $0x38] sm:$0xff]  }
 0x15f   :  { %v2119_v21 = vld [vmem:[#allocation8 + $0xb8] sm:$0xff]  }
 0x160   :  { %v423_v26 = vld [vmem:[%s2404_s4] sm:$0xf] }
 0x161   :  { %1147 = vmatpush1.bf16.msra.mxu0 %v2052_v27  ;;  %1229 = vmatpush1.bf16.msra.mxu1 %v2055_v28  ;;  %v428_v27 = vrot.slane %v423_v26, %v103_v23  ;;  %v436_v28 = vrot.slane %v423_v26, %v111_v38 }
 0x162   :  { %1148 = vmatprep.subr.bf16.mxu0 %v2060_v30  ;;  %1230 = vmatprep.subr.bf16.mxu1 %v2063_v31  ;;  %v432_v30 = vrot.slane %v423_v26, %v107_v25  ;;  %v440_v31 = vrot.slane %v423_v26, %v115_v29 }
 0x165   :  { %1149 = vmatpush1.bf16.msra.mxu0 %v2058_v32  ;;  %1231 = vmatpush1.bf16.msra.mxu1 %v2061_v33 }
 0x166   :  { %1150 = vmatprep.subr.bf16.mxu0 %v2066_v34  ;;  %1232 = vmatprep.subr.bf16.mxu1 %v2069_v35 }
 0x169   :  { %1151 = vmatpush1.bf16.msra.mxu0 %v2064_v36  ;;  %1233 = vmatpush1.bf16.msra.mxu1 %v2067_v37 }
 0x16a   :  { %1152 = vmatprep.subr.bf16.mxu0 %v2072_v39  ;;  %1234 = vmatprep.subr.bf16.mxu1 %v2075_v40 }
 0x16d   :  { %1153 = vmatpush1.bf16.msra.mxu0 %v2070_v42  ;;  %1235 = vmatpush1.bf16.msra.mxu1 %v2073_v43 }
 0x16e   :  { %1154 = vmatprep.subr.bf16.mxu0 %v2078_v45  ;;  %1236 = vmatprep.subr.bf16.mxu1 %v2081_v46 }
 0x171   :  { %1155 = vmatpush1.bf16.msra.mxu0 %v2076_v47  ;;  %1237 = vmatpush1.bf16.msra.mxu1 %v2079_v48 }
 0x172   :  { %1156 = vmatprep.subr.bf16.mxu0 %v2084_v50  ;;  %1238 = vmatprep.subr.bf16.mxu1 %v2087_v51  ;;  %v1773_v51 = vld [vmem:[%s2406_s6] ss:$0 sm:$0xff]  ;;  %s2251_s6 = smov [#allocation10]  }
 0x173   :  { %s1616_s29 = sshll.u32 %s2251_s6, 4  ;;  %s1617_s29 = int_to_ptr.vmem [resolvable:$true] %s1616_s29 }
 0x174   :  { %s2212_s30 = scalar_lea.vmem %s1617_s29, 128  ;;  %p2217_p5 = scmp.lt.s32.totalorder %s1617_s29, %s1617_s29 }
 0x175   :  { %1157 = vmatpush1.bf16.msra.mxu0 %v2082_v52  ;;  %1239 = vmatpush1.bf16.msra.mxu1 %v2085_v53  ;;  %p2213_p4 = scmp.ne.s32.totalorder %s1617_s29, %s2212_s30  ;;  %p2218_p6 = scmp.lt.s32.totalorder %s2212_s30, %s2212_s30 }
 0x176   :  { %1806 = vmatprep.subr.bf16.mxu0 %v2088_v24  ;;  %1828 = vmatprep.subr.bf16.mxu1 %v2089_v55 }
 0x177   :  { %p2219_p7 = por %p2218_p6, %p2217_p5 }
 0x178   :  { %1159 = vmatmul.mubr.bf16.vlgmr.msra.gmra.mrb[4].mxu0 %v293_v58  ;;  %1241 = vmatmul.mubr.bf16.vlgmr.msra.gmra.mrb[4].mxu1 %v293_v58 }
 0x179   :  { %1807 = vmatpush3.bf16.msra.mxu0 %v2090_v56  ;;  %1829 = vmatpush3.bf16.msra.mxu1 %v2091_v57  ;;  %p2220_p8 = pnand %p2219_p7, %p2213_p4 }
 0x17a   :  { %1808 = vmatprep.subr.bf16.mxu0 %v2092_v41  ;;  %1830 = vmatprep.subr.bf16.mxu1 %v2093_v59 }
 0x17d   :  { %1809 = vmatpush3.bf16.msra.mxu0 %v2094_v60  ;;  %1831 = vmatpush3.bf16.msra.mxu1 %v2095_v61 }
 0x17e   :  { %1810 = vmatprep.subr.bf16.mxu0 %v2096_v62  ;;  %1832 = vmatprep.subr.bf16.mxu1 %v2097_v63 }
 0x181   :  { %1811 = vmatpush3.bf16.msra.mxu0 %v2098_v0  ;;  %1833 = vmatpush3.bf16.msra.mxu1 %v2099_v1 }
 0x182   :  { %1812 = vmatprep.subr.bf16.mxu0 %v2100_v2  ;;  %1834 = vmatprep.subr.bf16.mxu1 %v2101_v3 }
 0x185   :  { %1813 = vmatpush3.bf16.msra.mxu0 %v2102_v4  ;;  %1835 = vmatpush3.bf16.msra.mxu1 %v2103_v5 }
 0x186   :  { %1814 = vmatprep.subr.bf16.mxu0 %v2104_v6  ;;  %1836 = vmatprep.subr.bf16.mxu1 %v2105_v7 }
 0x189   :  { %1815 = vmatpush3.bf16.msra.mxu0 %v2106_v8  ;;  %1837 = vmatpush3.bf16.msra.mxu1 %v2107_v9 }
 0x18a   :  { %1816 = vmatprep.subr.bf16.mxu0 %v2108_v10  ;;  %1838 = vmatprep.subr.bf16.mxu1 %v2109_v11 }
 0x18d   :  { %1817 = vmatpush3.bf16.msra.mxu0 %v2110_v12  ;;  %1839 = vmatpush3.bf16.msra.mxu1 %v2111_v13 }
 0x18e   :  { %1818 = vmatprep.subr.bf16.mxu0 %v2112_v14  ;;  %1840 = vmatprep.subr.bf16.mxu1 %v2113_v15 }
 0x191   :  { %1819 = vmatpush3.bf16.msra.mxu0 %v2114_v16  ;;  %1841 = vmatpush3.bf16.msra.mxu1 %v2115_v17 }
 0x192   :  { %1820 = vmatprep.subr.bf16.mxu0 %v2116_v18  ;;  %1842 = vmatprep.subr.bf16.mxu1 %v2117_v19 }
 0x195   :  { %1821 = vmatpush3.bf16.msra.mxu0 %v2118_v20  ;;  %1843 = vmatpush3.bf16.msra.mxu1 %v2119_v21 }
 0x24b   :  { %v1160_v32 = vpop.f32.mrb[4].mxu0  ;;  %v1242_v33 = vpop.f32.mrb[4].mxu1 }
 0x24c   :  { %v1850_v34 = vadd.f32 %v1160_v32, %v428_v27  ;;  %v1852_v35 = vadd.f32 %v1242_v33, %v436_v28  ;;  %v1162_v36 = vpop.f32.mrb[5].mxu0  ;;  %v1244_v37 = vpop.f32.mrb[5].mxu1 }
 0x24d   :  { %v1851_v39 = vadd.f32 %v1162_v36, %v432_v30  ;;  %v1853_v40 = vadd.f32 %v1244_v37, %v440_v31  ;;  %v1164_v42 = vpop.f32.mrb[6].mxu0  ;;  %v1246_v43 = vpop.f32.mrb[6].mxu1 }
 0x24e   :  { %v1249_v23 = vmax.f32 %v1850_v34, 0.0  ;;  %v1251_v44 = vmax.f32 %v1852_v35, 0.0  ;;  %v1165_v45 = vpop.f32.mrb[7].mxu0  ;;  %v1247_v38 = vpop.f32.mrb[7].mxu1 }
 0x24f   :  { %v1250_v46 = vmax.f32 %v1851_v39, 0.0  ;;  %v1252_v47 = vmax.f32 %v1853_v40, 0.0 }
 0x250   :  { %v1253_v22 = vpack.c.bf16 %v1249_v23, %v1249_v23  ;;  %v1255_v29 = vpack.c.bf16 %v1251_v44, %v1251_v44 }
 0x251   :  { %v1254_v25 = vpack.c.bf16 %v1250_v46, %v1250_v46  ;;  %v1256_v48 = vpack.c.bf16 %v1252_v47, %v1252_v47 }
 0x253   :  { %1552 = vmatprep.mubr.bf16.mxu0 %v1254_v25  ;;  %1592 = vmatprep.mubr.bf16.mxu1 %v1256_v48 }
 0x254   :  { %1553 = vmatmul.mubr.bf16.vlgmr.msra.gmra.mrb[8].mxu0 %v1253_v22  ;;  %1593 = vmatmul.mubr.bf16.vlgmr.msra.gmra.mrb[8].mxu1 %v1255_v29 }
 0x327   :  { %v1822_v49 = vpop.f32.mrb[8].mxu0  ;;  %v1844_v50 = vpop.f32.mrb[8].mxu1 }
 0x328   :  { %v1823_v52 = vpop.f32.mrb[9].mxu0  ;;  %v1845_v53 = vpop.f32.mrb[9].mxu1 }
 0x329   :  { %v1824_v54 = vadd.f32 %v1823_v52, %v1822_v49  ;;  %v1846_v24 = vadd.f32 %v1845_v53, %v1844_v50  ;;  %v1825_v55 = vpop.f32.mrb[10].mxu0  ;;  %v1847_v56 = vpop.f32.mrb[10].mxu1 }
 0x32a   :  { %v1826_v57 = vpop.f32.mrb[11].mxu0  ;;  %v1848_v58 = vpop.f32.mrb[11].mxu1 }
 0x32b   :  { %v1555_v41 = vadd.f32 %v1824_v54, %v1773_v51 }
 0x32d   :  { %v1595_v59 = vadd.f32 %v1846_v24, %v1555_v41 }
 0x32f   :  { %1600 = vmax.xlane.f32.xlu0 %v1595_v59 }
 0x3bc   :  { %v1601_v60 = vpop.xlane.xlu0 %1600 }
 0x3bd   :  { %v1602_v61 = vsub.f32 %v1595_v59, %v1601_v60 }
 0x3bf   :  { %v1603_v62 = vmul.f32 1.442695, %v1602_v61 }
 0x3c1   :  { %2120 = vpow2.f32 %v1603_v62 }
 0x3cb   :  { %v2121_v63 = vpop.eup %2120 }
 0x3cc   :  { %1605 = vadd.xlane.f32.xlu0 %v2121_v63 }
 0x459   :  { %v1606_v0 = vpop.xlane.xlu0 %1605 }
 0x45a   :  { %2122 = vrcp.f32 %v1606_v0 }
 0x464   :  { %v2123_v1 = vpop.eup %2122 }
 0x465   :  { %v1608_v2 = vmul.f32 %v2123_v1, %v2121_v63 }
 0x467   :  { %1609 = vst [vmem:[#allocation10] sm:$0xff] %v1608_v2 }
 0x468   :  { %2223 = shalt.err (!%p2220_p8)
}
 0x469   :  { %s2224_s10 = scalar_lea.hbm %s2407_s7, 128 }
 0x46a   :  { %p2225_p9 = scmp.ne.s32.totalorder %s2407_s7, %s2224_s10  ;;  %p2228_p10 = scmp.lt.u32.totalorder %s2224_s10, %s2407_s7 }
 0x46c   :  { %p2230_p11 = pnand %p2228_p10, %p2225_p9 }
 0x46e   :  { %2233 = shalt.err (!%p2230_p11)
}
 0x46f   :  { %1619 = dma.vmem_to_hbm [thread:$0]  %s1617_s29, 128, %s2407_s7, [#allocation4]  }
 0x470   :  { %2240 = dma.done.wait [#allocation4], 128  }
 0x471   :  { %2241 = vsyncadd [#allocation4], 4294967168 }
 0x472   :  { %1623 = vsyncpa [#allocation3], 1 }
 0x473   :  { %1624 = vsyncpa [#allocation6], 1 }
 0x474   :  { %1625 = vsyncpa [#allocation9], 1 }
 0x475   :  { %1626 = vsyncpa [#allocation4], 1 }

</bundles_post_ra>
